<compile_context>
chip_gen: v7x
topology: tpu7x:2x2x1
jax: 0.10.0
libtpu: 0.0.40
codegen_flags: <defaults>
</compile_context>

<pallas_src>
import functools

import jax
import jax.numpy as jnp
from jax.experimental import pallas as pl
from jax.experimental.pallas import tpu as pltpu


def _round_up(x, m):
    return (x + m - 1) // m * m


def _pad2d(w, rows, cols):
    out = jnp.zeros((rows, cols), w.dtype)
    return out.at[: w.shape[0], : w.shape[1]].set(w)


def _rnn_kernel(emb_ref, wv_ref, ww_ref, wu_ref, bvw_ref, bu_ref,
                out_ref, h_ref, *, seq_len, rows_per_step):
    """emb_ref/out_ref/h_ref: (S*Bp, Hp) time-major; weights (Hp, Hp); biases (1, Hp)."""
    # Phase 1: input projection for ALL timesteps in one MXU-friendly matmul.
    #   h[t*Bp:(t+1)*Bp, :] = emb_t @ Wv^T + (bv + bw)
    h_ref[...] = (
        jnp.dot(emb_ref[...], wv_ref[...], preferred_element_type=jnp.float32)
        + bvw_ref[...])

    # Phase 2: the true recurrence. Only p @ Ww depends on the previous step.
    # p lives in vregs as the fori_loop carry; each step reads its x_v block
    # from VMEM scratch and overwrites it in place with the hidden state s.
    ww = ww_ref[...]

    def step(i, p):
        r0 = pl.multiple_of(i * rows_per_step, rows_per_step)
        rows = pl.ds(r0, rows_per_step)
        s = jnp.maximum(
            h_ref[rows, :]
            + jnp.dot(p.astype(ww.dtype), ww, preferred_element_type=jnp.float32),
            0.0)
        h_ref[rows, :] = s
        return s

    p0 = jnp.zeros((rows_per_step, h_ref.shape[1]), jnp.float32)
    jax.lax.fori_loop(0, seq_len, step, p0, unroll=True)

    # Phase 3: output projection for ALL timesteps + one lane-dense slab store.
    out_ref[...] = (
        jnp.dot(h_ref[...].astype(wu_ref.dtype), wu_ref[...],
                preferred_element_type=jnp.float32)
        + bu_ref[...]).astype(out_ref.dtype)


def rnn_forward(emb, Wv, bv, Ww, bw, Wu, bu, *, compute_dtype=jnp.float32):
    """emb: (B, S, H) float32. Weights PyTorch-convention (out, in); biases (H,).

    compute_dtype=jnp.bfloat16 is the recommended setting on v6e/v7x (f32
    accumulation is kept via preferred_element_type); the f32 default preserves
    the exact torch numerics.
    """
    B, S, H = emb.shape
    Bp = _round_up(B, 8)      # sublane multiple
    Hp = _round_up(H, 128)    # lane multiple

    # Time-major, hardware-padded input, flattened to 2D: rows [t*Bp, (t+1)*Bp)
    # hold timestep t. Zero padding is exact: padded hidden columns stay zero
    # through the recurrence (zero weight rows/cols, relu(0)=0) and padded
    # batch rows never mix with real rows (the recurrence is row-wise).
    # TODO(synk): at production sizes fuse this layout change into the embedding
    # producer (or chunk the time axis with a grid) instead of a wrapper pass.
    emb_p = jnp.zeros((S, Bp, Hp), jnp.float32)
    emb_p = emb_p.at[:, :B, :H].set(jnp.transpose(emb, (1, 0, 2)).astype(jnp.float32))
    emb2d = emb_p.reshape(S * Bp, Hp).astype(compute_dtype)

    wv_p = _pad2d(Wv.T.astype(jnp.float32), Hp, Hp).astype(compute_dtype)
    ww_p = _pad2d(Ww.T.astype(jnp.float32), Hp, Hp).astype(compute_dtype)
    wu_p = _pad2d(Wu.T.astype(jnp.float32), Hp, Hp).astype(compute_dtype)
    bvw_p = _pad2d((bv + bw).astype(jnp.float32).reshape(1, H), 1, Hp)
    bu_p = _pad2d(bu.astype(jnp.float32).reshape(1, H), 1, Hp)

    kernel = functools.partial(_rnn_kernel, seq_len=S, rows_per_step=Bp)

    out2d = pl.pallas_call(
        kernel,
        out_shape=jax.ShapeDtypeStruct((S * Bp, Hp), jnp.float32),
        scratch_shapes=[pltpu.VMEM((S * Bp, Hp), jnp.float32)],
    )(emb2d, wv_p, ww_p, wu_p, bvw_p, bu_p)

    out = out2d.reshape(S, Bp, Hp)[:, :B, :H]
    return jnp.transpose(out, (1, 0, 2))


def rnn_reference(emb, Wv, bv, Ww, bw, Wu, bu):
    """Pure-JAX reference matching the PyTorch loop exactly."""
    B, S, H = emb.shape
    p = jnp.zeros((B, H), jnp.float32)
    outs = []
    for i in range(S):
        x_v = emb[:, i, :] @ Wv.T + bv
        p_w = p @ Ww.T + bw
        s = jnp.maximum(x_v + p_w, 0.0)
        outs.append(s @ Wu.T + bu)
        p = s
    return jnp.stack(outs, axis=1)


if __name__ == "__main__":
    B, S, H = 2, 8, 32   # batch, seq_len, hidding_num

    key = jax.random.PRNGKey(0)
    k_emb, k_wv, k_bv, k_ww, k_bw, k_wu, k_bu = jax.random.split(key, 7)

    emb = jax.random.normal(k_emb, (B, S, H), dtype=jnp.float32)

    # Deterministic parameter init (torch.nn.Linear shapes: weight (H,H), bias (H,))
    scale = 1.0 / jnp.sqrt(H)
    Wv = jax.random.uniform(k_wv, (H, H), jnp.float32, -scale, scale)
    bv = jax.random.uniform(k_bv, (H,), jnp.float32, -scale, scale)
    Ww = jax.random.uniform(k_ww, (H, H), jnp.float32, -scale, scale)
    bw = jax.random.uniform(k_bw, (H,), jnp.float32, -scale, scale)
    Wu = jax.random.uniform(k_wu, (H, H), jnp.float32, -scale, scale)
    bu = jax.random.uniform(k_bu, (H,), jnp.float32, -scale, scale)

    out = jax.jit(rnn_forward)(emb, Wv, bv, Ww, bw, Wu, bu)
    out = jax.block_until_ready(out)

    ref = rnn_reference(emb, Wv, bv, Ww, bw, Wu, bu)
    assert out.shape == (B, S, H)
    err = float(jnp.max(jnp.abs(out - ref)))
    assert jnp.allclose(out, ref, atol=5e-5, rtol=5e-5), err

    print("KERNEL_OK")
</pallas_src>

<mosaic_0001>
module attributes {stable_mosaic.version = 11 : i64} {
  func.func @_rnn_kernel(%arg0: memref<64x128xf32, #tpu.memory_space<vmem>>, %arg1: memref<128x128xf32, #tpu.memory_space<vmem>>, %arg2: memref<128x128xf32, #tpu.memory_space<vmem>>, %arg3: memref<128x128xf32, #tpu.memory_space<vmem>>, %arg4: memref<1x128xf32, #tpu.memory_space<vmem>>, %arg5: memref<1x128xf32, #tpu.memory_space<vmem>>, %arg6: memref<64x128xf32, #tpu.memory_space<vmem>>, %arg7: memref<64x128xf32, #tpu.memory_space<vmem>>) attributes {dimension_semantics = [], scalar_prefetch = 0 : i64, scratch_operands = 1 : i64, tpu.core_type = #tpu.core_type<tc>} {
    %c0 = arith.constant 0 : index
    %c0_0 = arith.constant 0 : index
    %0 = vector.load %arg0[%c0, %c0_0] : memref<64x128xf32, #tpu.memory_space<vmem>>, vector<64x128xf32>
    %c0_1 = arith.constant 0 : index
    %c0_2 = arith.constant 0 : index
    %1 = vector.load %arg1[%c0_1, %c0_2] : memref<128x128xf32, #tpu.memory_space<vmem>>, vector<128x128xf32>
    %cst = arith.constant dense<0.000000e+00> : vector<64x128xf32>
    %2 = tpu.matmul %0, %1, %cst {dimension_numbers = #tpu.dot_dimension_numbers<[1], [0], [0], [1], [0, 0, 1, 1], [], []>} : vector<64x128xf32>, vector<128x128xf32>, vector<64x128xf32> -> vector<64x128xf32>
    %c0_3 = arith.constant 0 : index
    %c0_4 = arith.constant 0 : index
    %3 = vector.load %arg4[%c0_3, %c0_4] : memref<1x128xf32, #tpu.memory_space<vmem>>, vector<1x128xf32>
    %4 = vector.broadcast %3 : vector<1x128xf32> to vector<64x128xf32>
    %5 = arith.addf %2, %4 : vector<64x128xf32>
    %c0_5 = arith.constant 0 : index
    %c0_6 = arith.constant 0 : index
    %6 = vector.load %arg7[%c0_5, %c0_6] : memref<64x128xf32, #tpu.memory_space<vmem>>, vector<64x128xf32>
    tpu.vector_store %arg7[%c0_5, %c0_6], %5 {strides = array<i32>} : memref<64x128xf32, #tpu.memory_space<vmem>>, vector<64x128xf32>,
    %c0_7 = arith.constant 0 : index
    %c0_8 = arith.constant 0 : index
    %7 = vector.load %arg2[%c0_7, %c0_8] : memref<128x128xf32, #tpu.memory_space<vmem>>, vector<128x128xf32>
    %cst_9 = arith.constant 0.000000e+00 : f32
    %8 = vector.broadcast %cst_9 : f32 to vector<8x128xf32>
    %c0_i32 = arith.constant 0 : i32
    %c8_i32 = arith.constant 8 : i32
    %9 = arith.muli %c0_i32, %c8_i32 : i32
    %10 = tpu.assume_multiple %9, 8 : i32
    %11 = arith.index_cast %10 : i32 to index
    %c0_10 = arith.constant 0 : index
    %12 = vector.load %arg7[%11, %c0_10] : memref<64x128xf32, #tpu.memory_space<vmem>>, vector<8x128xf32>
    %cst_11 = arith.constant dense<0.000000e+00> : vector<8x128xf32>
    %13 = tpu.matmul %8, %7, %cst_11 {dimension_numbers = #tpu.dot_dimension_numbers<[1], [0], [0], [1], [0, 0, 1, 1], [], []>} : vector<8x128xf32>, vector<128x128xf32>, vector<8x128xf32> -> vector<8x128xf32>
    %14 = arith.addf %12, %13 : vector<8x128xf32>
    %cst_12 = arith.constant 0.000000e+00 : f32
    %15 = vector.broadcast %cst_12 : f32 to vector<8x128xf32>
    %16 = arith.maximumf %14, %15 : vector<8x128xf32>
    %17 = arith.index_cast %10 : i32 to index
    %c0_13 = arith.constant 0 : index
    %18 = vector.load %arg7[%17, %c0_13] : memref<64x128xf32, #tpu.memory_space<vmem>>, vector<8x128xf32>
    tpu.vector_store %arg7[%17, %c0_13], %16 {strides = array<i32>} : memref<64x128xf32, #tpu.memory_space<vmem>>, vector<8x128xf32>,
    %c1_i32 = arith.constant 1 : i32
    %c8_i32_14 = arith.constant 8 : i32
    %19 = arith.muli %c1_i32, %c8_i32_14 : i32
    %20 = tpu.assume_multiple %19, 8 : i32
    %21 = arith.index_cast %20 : i32 to index
    %c0_15 = arith.constant 0 : index
    %22 = vector.load %arg7[%21, %c0_15] : memref<64x128xf32, #tpu.memory_space<vmem>>, vector<8x128xf32>
    %cst_16 = arith.constant dense<0.000000e+00> : vector<8x128xf32>
    %23 = tpu.matmul %16, %7, %cst_16 {dimension_numbers = #tpu.dot_dimension_numbers<[1], [0], [0], [1], [0, 0, 1, 1], [], []>} : vector<8x128xf32>, vector<128x128xf32>, vector<8x128xf32> -> vector<8x128xf32>
    %24 = arith.addf %22, %23 : vector<8x128xf32>
    %cst_17 = arith.constant 0.000000e+00 : f32
    %25 = vector.broadcast %cst_17 : f32 to vector<8x128xf32>
    %26 = arith.maximumf %24, %25 : vector<8x128xf32>
    %27 = arith.index_cast %20 : i32 to index
    %c0_18 = arith.constant 0 : index
    %28 = vector.load %arg7[%27, %c0_18] : memref<64x128xf32, #tpu.memory_space<vmem>>, vector<8x128xf32>
    tpu.vector_store %arg7[%27, %c0_18], %26 {strides = array<i32>} : memref<64x128xf32, #tpu.memory_space<vmem>>, vector<8x128xf32>,
    %c2_i32 = arith.constant 2 : i32
    %c8_i32_19 = arith.constant 8 : i32
    %29 = arith.muli %c2_i32, %c8_i32_19 : i32
    %30 = tpu.assume_multiple %29, 8 : i32
    %31 = arith.index_cast %30 : i32 to index
    %c0_20 = arith.constant 0 : index
    %32 = vector.load %arg7[%31, %c0_20] : memref<64x128xf32, #tpu.memory_space<vmem>>, vector<8x128xf32>
    %cst_21 = arith.constant dense<0.000000e+00> : vector<8x128xf32>
    %33 = tpu.matmul %26, %7, %cst_21 {dimension_numbers = #tpu.dot_dimension_numbers<[1], [0], [0], [1], [0, 0, 1, 1], [], []>} : vector<8x128xf32>, vector<128x128xf32>, vector<8x128xf32> -> vector<8x128xf32>
    %34 = arith.addf %32, %33 : vector<8x128xf32>
    %cst_22 = arith.constant 0.000000e+00 : f32
    %35 = vector.broadcast %cst_22 : f32 to vector<8x128xf32>
    %36 = arith.maximumf %34, %35 : vector<8x128xf32>
    %37 = arith.index_cast %30 : i32 to index
    %c0_23 = arith.constant 0 : index
    %38 = vector.load %arg7[%37, %c0_23] : memref<64x128xf32, #tpu.memory_space<vmem>>, vector<8x128xf32>
    tpu.vector_store %arg7[%37, %c0_23], %36 {strides = array<i32>} : memref<64x128xf32, #tpu.memory_space<vmem>>, vector<8x128xf32>,
    %c3_i32 = arith.constant 3 : i32
    %c8_i32_24 = arith.constant 8 : i32
    %39 = arith.muli %c3_i32, %c8_i32_24 : i32
    %40 = tpu.assume_multiple %39, 8 : i32
    %41 = arith.index_cast %40 : i32 to index
    %c0_25 = arith.constant 0 : index
    %42 = vector.load %arg7[%41, %c0_25] : memref<64x128xf32, #tpu.memory_space<vmem>>, vector<8x128xf32>
    %cst_26 = arith.constant dense<0.000000e+00> : vector<8x128xf32>
    %43 = tpu.matmul %36, %7, %cst_26 {dimension_numbers = #tpu.dot_dimension_numbers<[1], [0], [0], [1], [0, 0, 1, 1], [], []>} : vector<8x128xf32>, vector<128x128xf32>, vector<8x128xf32> -> vector<8x128xf32>
    %44 = arith.addf %42, %43 : vector<8x128xf32>
    %cst_27 = arith.constant 0.000000e+00 : f32
    %45 = vector.broadcast %cst_27 : f32 to vector<8x128xf32>
    %46 = arith.maximumf %44, %45 : vector<8x128xf32>
    %47 = arith.index_cast %40 : i32 to index
    %c0_28 = arith.constant 0 : index
    %48 = vector.load %arg7[%47, %c0_28] : memref<64x128xf32, #tpu.memory_space<vmem>>, vector<8x128xf32>
    tpu.vector_store %arg7[%47, %c0_28], %46 {strides = array<i32>} : memref<64x128xf32, #tpu.memory_space<vmem>>, vector<8x128xf32>,
    %c4_i32 = arith.constant 4 : i32
    %c8_i32_29 = arith.constant 8 : i32
    %49 = arith.muli %c4_i32, %c8_i32_29 : i32
    %50 = tpu.assume_multiple %49, 8 : i32
    %51 = arith.index_cast %50 : i32 to index
    %c0_30 = arith.constant 0 : index
    %52 = vector.load %arg7[%51, %c0_30] : memref<64x128xf32, #tpu.memory_space<vmem>>, vector<8x128xf32>
    %cst_31 = arith.constant dense<0.000000e+00> : vector<8x128xf32>
    %53 = tpu.matmul %46, %7, %cst_31 {dimension_numbers = #tpu.dot_dimension_numbers<[1], [0], [0], [1], [0, 0, 1, 1], [], []>} : vector<8x128xf32>, vector<128x128xf32>, vector<8x128xf32> -> vector<8x128xf32>
    %54 = arith.addf %52, %53 : vector<8x128xf32>
    %cst_32 = arith.constant 0.000000e+00 : f32
    %55 = vector.broadcast %cst_32 : f32 to vector<8x128xf32>
    %56 = arith.maximumf %54, %55 : vector<8x128xf32>
    %57 = arith.index_cast %50 : i32 to index
    %c0_33 = arith.constant 0 : index
    %58 = vector.load %arg7[%57, %c0_33] : memref<64x128xf32, #tpu.memory_space<vmem>>, vector<8x128xf32>
    tpu.vector_store %arg7[%57, %c0_33], %56 {strides = array<i32>} : memref<64x128xf32, #tpu.memory_space<vmem>>, vector<8x128xf32>,
    %c5_i32 = arith.constant 5 : i32
    %c8_i32_34 = arith.constant 8 : i32
    %59 = arith.muli %c5_i32, %c8_i32_34 : i32
    %60 = tpu.assume_multiple %59, 8 : i32
    %61 = arith.index_cast %60 : i32 to index
    %c0_35 = arith.constant 0 : index
    %62 = vector.load %arg7[%61, %c0_35] : memref<64x128xf32, #tpu.memory_space<vmem>>, vector<8x128xf32>
    %cst_36 = arith.constant dense<0.000000e+00> : vector<8x128xf32>
    %63 = tpu.matmul %56, %7, %cst_36 {dimension_numbers = #tpu.dot_dimension_numbers<[1], [0], [0], [1], [0, 0, 1, 1], [], []>} : vector<8x128xf32>, vector<128x128xf32>, vector<8x128xf32> -> vector<8x128xf32>
    %64 = arith.addf %62, %63 : vector<8x128xf32>
    %cst_37 = arith.constant 0.000000e+00 : f32
    %65 = vector.broadcast %cst_37 : f32 to vector<8x128xf32>
    %66 = arith.maximumf %64, %65 : vector<8x128xf32>
    %67 = arith.index_cast %60 : i32 to index
    %c0_38 = arith.constant 0 : index
    %68 = vector.load %arg7[%67, %c0_38] : memref<64x128xf32, #tpu.memory_space<vmem>>, vector<8x128xf32>
    tpu.vector_store %arg7[%67, %c0_38], %66 {strides = array<i32>} : memref<64x128xf32, #tpu.memory_space<vmem>>, vector<8x128xf32>,
    %c6_i32 = arith.constant 6 : i32
    %c8_i32_39 = arith.constant 8 : i32
    %69 = arith.muli %c6_i32, %c8_i32_39 : i32
    %70 = tpu.assume_multiple %69, 8 : i32
    %71 = arith.index_cast %70 : i32 to index
    %c0_40 = arith.constant 0 : index
    %72 = vector.load %arg7[%71, %c0_40] : memref<64x128xf32, #tpu.memory_space<vmem>>, vector<8x128xf32>
    %cst_41 = arith.constant dense<0.000000e+00> : vector<8x128xf32>
    %73 = tpu.matmul %66, %7, %cst_41 {dimension_numbers = #tpu.dot_dimension_numbers<[1], [0], [0], [1], [0, 0, 1, 1], [], []>} : vector<8x128xf32>, vector<128x128xf32>, vector<8x128xf32> -> vector<8x128xf32>
    %74 = arith.addf %72, %73 : vector<8x128xf32>
    %cst_42 = arith.constant 0.000000e+00 : f32
    %75 = vector.broadcast %cst_42 : f32 to vector<8x128xf32>
    %76 = arith.maximumf %74, %75 : vector<8x128xf32>
    %77 = arith.index_cast %70 : i32 to index
    %c0_43 = arith.constant 0 : index
    %78 = vector.load %arg7[%77, %c0_43] : memref<64x128xf32, #tpu.memory_space<vmem>>, vector<8x128xf32>
    tpu.vector_store %arg7[%77, %c0_43], %76 {strides = array<i32>} : memref<64x128xf32, #tpu.memory_space<vmem>>, vector<8x128xf32>,
    %c7_i32 = arith.constant 7 : i32
    %c8_i32_44 = arith.constant 8 : i32
    %79 = arith.muli %c7_i32, %c8_i32_44 : i32
    %80 = tpu.assume_multiple %79, 8 : i32
    %81 = arith.index_cast %80 : i32 to index
    %c0_45 = arith.constant 0 : index
    %82 = vector.load %arg7[%81, %c0_45] : memref<64x128xf32, #tpu.memory_space<vmem>>, vector<8x128xf32>
    %cst_46 = arith.constant dense<0.000000e+00> : vector<8x128xf32>
    %83 = tpu.matmul %76, %7, %cst_46 {dimension_numbers = #tpu.dot_dimension_numbers<[1], [0], [0], [1], [0, 0, 1, 1], [], []>} : vector<8x128xf32>, vector<128x128xf32>, vector<8x128xf32> -> vector<8x128xf32>
    %84 = arith.addf %82, %83 : vector<8x128xf32>
    %cst_47 = arith.constant 0.000000e+00 : f32
    %85 = vector.broadcast %cst_47 : f32 to vector<8x128xf32>
    %86 = arith.maximumf %84, %85 : vector<8x128xf32>
    %87 = arith.index_cast %80 : i32 to index
    %c0_48 = arith.constant 0 : index
    %88 = vector.load %arg7[%87, %c0_48] : memref<64x128xf32, #tpu.memory_space<vmem>>, vector<8x128xf32>
    tpu.vector_store %arg7[%87, %c0_48], %86 {strides = array<i32>} : memref<64x128xf32, #tpu.memory_space<vmem>>, vector<8x128xf32>,
    %c8_i32_49 = arith.constant 8 : i32
    %c0_50 = arith.constant 0 : index
    %c0_51 = arith.constant 0 : index
    %89 = vector.load %arg7[%c0_50, %c0_51] : memref<64x128xf32, #tpu.memory_space<vmem>>, vector<64x128xf32>
    %c0_52 = arith.constant 0 : index
    %c0_53 = arith.constant 0 : index
    %90 = vector.load %arg3[%c0_52, %c0_53] : memref<128x128xf32, #tpu.memory_space<vmem>>, vector<128x128xf32>
    %cst_54 = arith.constant dense<0.000000e+00> : vector<64x128xf32>
    %91 = tpu.matmul %89, %90, %cst_54 {dimension_numbers = #tpu.dot_dimension_numbers<[1], [0], [0], [1], [0, 0, 1, 1], [], []>} : vector<64x128xf32>, vector<128x128xf32>, vector<64x128xf32> -> vector<64x128xf32>
    %c0_55 = arith.constant 0 : index
    %c0_56 = arith.constant 0 : index
    %92 = vector.load %arg5[%c0_55, %c0_56] : memref<1x128xf32, #tpu.memory_space<vmem>>, vector<1x128xf32>
    %93 = vector.broadcast %92 : vector<1x128xf32> to vector<64x128xf32>
    %94 = arith.addf %91, %93 : vector<64x128xf32>
    %c0_57 = arith.constant 0 : index
    %c0_58 = arith.constant 0 : index
    %95 = vector.load %arg6[%c0_57, %c0_58] : memref<64x128xf32, #tpu.memory_space<vmem>>, vector<64x128xf32>
    tpu.vector_store %arg6[%c0_57, %c0_58], %94 {strides = array<i32>} : memref<64x128xf32, #tpu.memory_space<vmem>>, vector<64x128xf32>,
    return
  }
}

</mosaic_0001>

<bundles_post_ra>
// kernel: rnn_forward.1
= control target key start
LH: loop header
LB: loop body
LE: loop exit
PB: predicated region body
PF: predicated region fallthrough
CT: control target
= control target key end

     0   :  { %v1743_v2 = vmov 0.0|0.0   ;;  %vm1744_vm0 = vmmov 0   ;;  %v1745_v4 = vmov 0.0   ;;  %s2200_s1 = inlined_call_operand.vmem [shape: f32[128,128], index: 1, kind: input, shape index: {}]   ;;  %s2201_s2 = inlined_call_operand.vmem [shape: f32[128,128], index: 2, kind: input, shape index: {}]   ;;  %s2202_s0 = inlined_call_operand.vmem [shape: f32[64,128], index: 0, kind: input, shape index: {}]   ;;  %s2203_s4 = inlined_call_operand.vmem [shape: f32[1,128], index: 4, kind: input, shape index: {}]   ;;  %s2204_s3 = inlined_call_operand.vmem [shape: f32[128,128], index: 3, kind: input, shape index: {}]   ;;  %s2205_s5 = inlined_call_operand.vmem [shape: f32[1,128], index: 5, kind: input, shape index: {}]   ;;  %s2206_s6 = inlined_call_operand.vmem [shape: f32[64,128], index: 6, kind: output, shape index: {}]  }
   0x1   :  { %v31_v0 = vld [vmem:[%s2200_s1] sm:$0xff]  ;;  %v32_v1 = vld [vmem:[%s2200_s1 + $0x8] sm:$0xff]  ;;  %1516 = vmatprep.subr.bf16.mxu1 %v1743_v2  ;;  %1192 = vmatprep.mubr.msk.f32.mxu1 %vm1744_vm0, %v1745_v4  ;;  %v33_v7 = vld [vmem:[%s2200_s1 + $0x10] sm:$0xff] }
   0x2   :  { %v167_v3 = vld [vmem:[%s2201_s2] sm:$0xff]  ;;  %v1484_v5 = vpack.c.bf16 %v32_v1, %v31_v0  ;;  %v168_v6 = vld [vmem:[%s2201_s2 + $0x8] sm:$0xff]  ;;  %v34_v8 = vld [vmem:[%s2200_s1 + $0x18] sm:$0xff] }
   0x3   :  { %v1802_v9 = vpack.c.bf16 %v168_v6, %v167_v3  ;;  %v1488_v10 = vpack.c.bf16 %v34_v8, %v33_v7  ;;  %v169_v11 = vld [vmem:[%s2201_s2 + $0x10] sm:$0xff]  ;;  %v170_v12 = vld [vmem:[%s2201_s2 + $0x18] sm:$0xff]  ;;  %v35_v13 = vld [vmem:[%s2200_s1 + $0x20] sm:$0xff] }
   0x4   :  { %1485 = vmatprep.subr.bf16.mxu0 %v1484_v5  ;;  %v36_v14 = vld [vmem:[%s2200_s1 + $0x28] sm:$0xff]  ;;  %v1817_v15 = vpack.c.bf16 %v170_v12, %v169_v11  ;;  %v171_v17 = vld [vmem:[%s2201_s2 + $0x20] sm:$0xff]  ;;  %v37_v19 = vld [vmem:[%s2200_s1 + $0x30] sm:$0xff] }
   0x5   :  { %1487 = vmatpush3.bf16.msra.mxu0 %v1484_v5  ;;  %1518 = vmatpush3.bf16.msra.mxu1 %v1802_v9  ;;  %v1492_v16 = vpack.c.bf16 %v36_v14, %v35_v13  ;;  %v172_v18 = vld [vmem:[%s2201_s2 + $0x28] sm:$0xff]  ;;  %v38_v20 = vld [vmem:[%s2200_s1 + $0x38] sm:$0xff]  ;;  %v173_v23 = vld [vmem:[%s2201_s2 + $0x30] sm:$0xff] }
   0x6   :  { %1489 = vmatprep.subr.bf16.mxu0 %v1488_v10  ;;  %1519 = vmatprep.subr.bf16.mxu1 %v1743_v2  ;;  %v1833_v21 = vpack.c.bf16 %v172_v18, %v171_v17  ;;  %v1496_v22 = vpack.c.bf16 %v38_v20, %v37_v19  ;;  %v174_v24 = vld [vmem:[%s2201_s2 + $0x38] sm:$0xff]  ;;  %v39_v25 = vld [vmem:[%s2200_s1 + $0x40] sm:$0xff]  ;;  %v40_v26 = vld [vmem:[%s2200_s1 + $0x48] sm:$0xff] }
   0x7   :  { %v23_v27 = vld [vmem:[%s2202_s0] sm:$0xff]  ;;  %v1852_v28 = vpack.c.bf16 %v174_v24, %v173_v23  ;;  %v1500_v29 = vpack.c.bf16 %v40_v26, %v39_v25  ;;  %v176_v31 = vld [vmem:[%s2201_s2 + $0x48] sm:$0xff]  ;;  %v41_v32 = vld [vmem:[%s2200_s1 + $0x50] sm:$0xff] }
   0x8   :  { %1148 = vmatprep.mubr.f32.mxu0 %v23_v27  ;;  %v175_v30 = vld [vmem:[%s2201_s2 + $0x40] sm:$0xff]  ;;  %v42_v33 = vld [vmem:[%s2200_s1 + $0x58] sm:$0xff]  ;;  %v177_v36 = vld [vmem:[%s2201_s2 + $0x50] sm:$0xff] }
   0x9   :  { %1491 = vmatpush3.bf16.msra.mxu0 %v1488_v10  ;;  %1521 = vmatpush3.bf16.msra.mxu1 %v1817_v15  ;;  %v1868_v34 = vpack.c.bf16 %v176_v31, %v175_v30  ;;  %v1504_v35 = vpack.c.bf16 %v42_v33, %v41_v32  ;;  %v178_v37 = vld [vmem:[%s2201_s2 + $0x58] sm:$0xff]  ;;  %v43_v38 = vld [vmem:[%s2200_s1 + $0x60] sm:$0xff]  ;;  %v44_v39 = vld [vmem:[%s2200_s1 + $0x68] sm:$0xff] }
   0xa   :  { %1493 = vmatprep.subr.bf16.mxu0 %v1492_v16  ;;  %1522 = vmatprep.subr.bf16.mxu1 %v1743_v2  ;;  %v1884_v40 = vpack.c.bf16 %v178_v37, %v177_v36  ;;  %v1508_v41 = vpack.c.bf16 %v44_v39, %v43_v38  ;;  %v179_v42 = vld [vmem:[%s2201_s2 + $0x60] sm:$0xff]  ;;  %v180_v43 = vld [vmem:[%s2201_s2 + $0x68] sm:$0xff]  ;;  %v45_v44 = vld [vmem:[%s2200_s1 + $0x70] sm:$0xff] }
   0xb   :  { %v46_v45 = vld [vmem:[%s2200_s1 + $0x78] sm:$0xff]  ;;  %v1900_v46 = vpack.c.bf16 %v180_v43, %v179_v42  ;;  %v181_v48 = vld [vmem:[%s2201_s2 + $0x70] sm:$0xff]  ;;  %v24_v51 = vld [vmem:[%s2202_s0 + $0x8] sm:$0xff] }
   0xc   :  { %v1512_v47 = vpack.c.bf16 %v46_v45, %v45_v44  ;;  %v182_v49 = vld [vmem:[%s2201_s2 + $0x78] sm:$0xff]  ;;  %v25_v52 = vld [vmem:[%s2202_s0 + $0x10] sm:$0xff]  ;;  %v27_v54 = vld [vmem:[%s2202_s0 + $0x20] sm:$0xff] }
   0xd   :  { %1495 = vmatpush3.bf16.msra.mxu0 %v1492_v16  ;;  %1524 = vmatpush3.bf16.msra.mxu1 %v1833_v21  ;;  %v1910_v50 = vpack.c.bf16 %v182_v49, %v181_v48  ;;  %v26_v53 = vld [vmem:[%s2202_s0 + $0x18] sm:$0xff]  ;;  %v28_v55 = vld [vmem:[%s2202_s0 + $0x28] sm:$0xff]  ;;  %v29_v56 = vld [vmem:[%s2202_s0 + $0x30] sm:$0xff] }
   0xe   :  { %1497 = vmatprep.subr.bf16.mxu0 %v1496_v22  ;;  %1525 = vmatprep.subr.bf16.mxu1 %v1743_v2  ;;  %v30_v57 = vld [vmem:[%s2202_s0 + $0x38] sm:$0xff]  ;;  %v1977_v58 = vld [vmem:[%s2203_s4] ss:$0 sm:$0xff]  ;;  %v796_v42 = vld [vmem:[%s2204_s3 + $0x30] sm:$0xff] }
   0xf   :  { %v794_v39 = vld [vmem:[%s2204_s3 + $0x20] sm:$0xff]  ;;  %v797_v43 = vld [vmem:[%s2204_s3 + $0x38] sm:$0xff]  ;;  %v800_v48 = vld [vmem:[%s2204_s3 + $0x50] sm:$0xff] }
  0x10   :  { %v1720_v44 = vpack.c.bf16 %v797_v43, %v796_v42  ;;  %v798_v45 = vld [vmem:[%s2204_s3 + $0x40] sm:$0xff]  ;;  %v801_v49 = vld [vmem:[%s2204_s3 + $0x58] sm:$0xff] }
  0x11   :  { %1499 = vmatpush3.bf16.msra.mxu0 %v1496_v22  ;;  %1527 = vmatpush3.bf16.msra.mxu1 %v1852_v28 }
  0x12   :  { %1501 = vmatprep.subr.bf16.mxu0 %v1500_v29  ;;  %1528 = vmatprep.subr.bf16.mxu1 %v1743_v2 }
  0x15   :  { %1503 = vmatpush3.bf16.msra.mxu0 %v1500_v29  ;;  %1530 = vmatpush3.bf16.msra.mxu1 %v1868_v34 }
  0x16   :  { %1505 = vmatprep.subr.bf16.mxu0 %v1504_v35  ;;  %1531 = vmatprep.subr.bf16.mxu1 %v1743_v2 }
  0x19   :  { %1507 = vmatpush3.bf16.msra.mxu0 %v1504_v35  ;;  %1533 = vmatpush3.bf16.msra.mxu1 %v1884_v40 }
  0x1a   :  { %1509 = vmatprep.subr.bf16.mxu0 %v1508_v41  ;;  %1534 = vmatprep.subr.bf16.mxu1 %v1743_v2 }
  0x1d   :  { %1511 = vmatpush3.bf16.msra.mxu0 %v1508_v41  ;;  %1536 = vmatpush3.bf16.msra.mxu1 %v1900_v46 }
  0x1e   :  { %1513 = vmatprep.subr.bf16.mxu0 %v1512_v47  ;;  %1537 = vmatprep.subr.bf16.mxu1 %v1743_v2 }
  0x21   :  { %1515 = vmatpush3.bf16.msra.mxu0 %v1512_v47  ;;  %1539 = vmatpush3.bf16.msra.mxu1 %v1910_v50 }
  0x22   :  { %1540 = vmatprep.subr.bf16.mxu0 %v1743_v2  ;;  %1564 = vmatprep.subr.bf16.mxu1 %v1743_v2 }
  0x24   :  { %1149 = vmatmul.mubr.f32.vlgmr.msra.gmra.mrb[0].mxu0 %v24_v51  ;;  %1193 = vmatmul.mubr.f32.vlgmr.msra.gmra.mrb[0].mxu1 %v1745_v4  ;;  %v802_v51 = vld [vmem:[%s2204_s3 + $0x60] sm:$0xff] }
  0x25   :  { %1542 = vmatpush3.bf16.msra.mxu0 %v1802_v9  ;;  %1151 = vmatprep.mubr.f32.mxu0 %v25_v52  ;;  %v803_v52 = vld [vmem:[%s2204_s3 + $0x68] sm:$0xff] }
  0x26   :  { %1543 = vmatprep.subr.bf16.mxu0 %v1743_v2  ;;  %1566 = vmatpush3.bf16.msra.mxu1 %v1802_v9 }
  0x27   :  { %1567 = vmatprep.subr.bf16.mxu1 %v1743_v2  ;;  %1262 = vmatprep.mubr.msk.f32.mxu1 %vm1744_vm0, %v1745_v4 }
  0x28   :  { %1152 = vmatmul.mubr.f32.gmra.mrb[2].mxu0 %v26_v53  ;;  %v1732_v53 = vpack.c.bf16 %v803_v52, %v802_v51 }
  0x29   :  { %1545 = vmatpush3.bf16.msra.mxu0 %v1817_v15  ;;  %1154 = vmatprep.mubr.f32.mxu0 %v27_v54  ;;  %v804_v54 = vld [vmem:[%s2204_s3 + $0x70] sm:$0xff] }
  0x2a   :  { %1546 = vmatprep.subr.bf16.mxu0 %v1743_v2  ;;  %1569 = vmatpush3.bf16.msra.mxu1 %v1817_v15 }
  0x2b   :  { %1570 = vmatprep.subr.bf16.mxu1 %v1743_v2 }
  0x2c   :  { %1155 = vmatmul.mubr.f32.gmra.mrb[4].mxu0 %v28_v55  ;;  %v805_v55 = vld [vmem:[%s2204_s3 + $0x78] sm:$0xff] }
  0x2d   :  { %1548 = vmatpush3.bf16.msra.mxu0 %v1833_v21  ;;  %1157 = vmatprep.mubr.f32.mxu0 %v29_v56  ;;  %v1736_v56 = vpack.c.bf16 %v805_v55, %v804_v54 }
  0x2e   :  { %1549 = vmatprep.subr.bf16.mxu0 %v1743_v2  ;;  %1572 = vmatpush3.bf16.msra.mxu1 %v1833_v21 }
  0x2f   :  { %1573 = vmatprep.subr.bf16.mxu1 %v1743_v2 }
  0x30   :  { %1158 = vmatmul.mubr.f32.gmra.mrb[6].mxu0 %v30_v57 }
  0x31   :  { %1551 = vmatpush3.bf16.msra.mxu0 %v1852_v28  ;;  %1227 = vmatprep.mubr.msk.f32.mxu0 %vm1744_vm0, %v1745_v4 }
  0x32   :  { %1552 = vmatprep.subr.bf16.mxu0 %v1743_v2  ;;  %1575 = vmatpush3.bf16.msra.mxu1 %v1852_v28 }
  0x33   :  { %1576 = vmatprep.subr.bf16.mxu1 %v1743_v2 }
  0x35   :  { %1554 = vmatpush3.bf16.msra.mxu0 %v1868_v34 }
  0x36   :  { %1555 = vmatprep.subr.bf16.mxu0 %v1743_v2  ;;  %1578 = vmatpush3.bf16.msra.mxu1 %v1868_v34 }
  0x37   :  { %1579 = vmatprep.subr.bf16.mxu1 %v1743_v2 }
  0x39   :  { %1557 = vmatpush3.bf16.msra.mxu0 %v1884_v40 }
  0x3a   :  { %1558 = vmatprep.subr.bf16.mxu0 %v1743_v2  ;;  %1581 = vmatpush3.bf16.msra.mxu1 %v1884_v40 }
  0x3b   :  { %1582 = vmatprep.subr.bf16.mxu1 %v1743_v2 }
  0x3d   :  { %1560 = vmatpush3.bf16.msra.mxu0 %v1900_v46 }
  0x3e   :  { %1561 = vmatprep.subr.bf16.mxu0 %v1743_v2  ;;  %1584 = vmatpush3.bf16.msra.mxu1 %v1900_v46 }
  0x3f   :  { %1585 = vmatprep.subr.bf16.mxu1 %v1743_v2 }
  0x41   :  { %1563 = vmatpush3.bf16.msra.mxu0 %v1910_v50 }
  0x42   :  { %1587 = vmatpush3.bf16.msra.mxu1 %v1910_v50  ;;  %1588 = vmatprep.subr.bf16.mxu0 %v1743_v2 }
  0x43   :  { %1612 = vmatprep.subr.bf16.mxu1 %v1743_v2 }
  0xf7   :  { %v1150_v59 = vpop.f32.mrb[0].mxu0  ;;  %v250_v60 = vpop.f32.mrb[0].mxu1 }
  0xf8   :  { %v120_v61 = vpop.f32.mrb[1].mxu0  ;;  %v1194_v62 = vpop.f32.mrb[1].mxu1  ;;  %v126_v11 = vadd.f32 %v1150_v59, %v1977_v58 }
  0xf9   :  { %v121_v63 = vadd.f32 %v1977_v58, %v120_v61 }
  0xfb   :  { %v1980_v0 = vadd.f32 %v250_v60, %v121_v63  ;;  %v1982_v1 = vpop.f32.mrb[2].mxu0  ;;  %v931_v63 = vld [vmem:[%s2205_s5] ss:$0 sm:$0xff] }
  0xfc   :  { %v130_v3 = vpop.f32.mrb[3].mxu0  ;;  %v136_v23 = vadd.f32 %v1982_v1, %v1977_v58 }
  0xfd   :  { %v255_v5 = vmax.f32 %v1980_v0, 0.0  ;;  %v131_v17 = vadd.f32 %v1977_v58, %v130_v3 }
  0xff   :  { %1228 = vmatmul.mubr.f32.vlgmr.msra.gmra.mrb[8].mxu0 %v255_v5  ;;  %v1987_v6 = vpop.f32.mrb[4].mxu0 }
 0x100   :  { %v1989_v7 = vpop.f32.mrb[5].mxu0  ;;  %1590 = vmatpush3.bf16.msra.mxu0 %v1802_v9  ;;  %1297 = vmatprep.mubr.msk.f32.mxu0 %vm1744_vm0, %v1745_v4 }
 0x101   :  { %1591 = vmatprep.subr.bf16.mxu0 %v1743_v2  ;;  %v141_v29 = vadd.f32 %v1977_v58, %v1989_v7 }
 0x103   :  { %v2009_v8 = vpop.f32.mrb[6].mxu0 }
 0x104   :  { %1593 = vmatpush3.bf16.msra.mxu0 %v1817_v15  ;;  %v2011_v10 = vpop.f32.mrb[7].mxu0 }
 0x105   :  { %1594 = vmatprep.subr.bf16.mxu0 %v1743_v2  ;;  %v151_v57 = vadd.f32 %v1977_v58, %v2011_v10 }
 0x108   :  { %1596 = vmatpush3.bf16.msra.mxu0 %v1833_v21 }
 0x109   :  { %1597 = vmatprep.subr.bf16.mxu0 %v1743_v2 }
 0x10c   :  { %1599 = vmatpush3.bf16.msra.mxu0 %v1852_v28 }
 0x10d   :  { %1600 = vmatprep.subr.bf16.mxu0 %v1743_v2 }
 0x110   :  { %1602 = vmatpush3.bf16.msra.mxu0 %v1868_v34 }
 0x111   :  { %1603 = vmatprep.subr.bf16.mxu0 %v1743_v2 }
 0x114   :  { %1605 = vmatpush3.bf16.msra.mxu0 %v1884_v40 }
 0x115   :  { %1606 = vmatprep.subr.bf16.mxu0 %v1743_v2 }
 0x118   :  { %1608 = vmatpush3.bf16.msra.mxu0 %v1900_v46 }
 0x119   :  { %1609 = vmatprep.subr.bf16.mxu0 %v1743_v2 }
 0x11c   :  { %1611 = vmatpush3.bf16.msra.mxu0 %v1910_v50 }
 0x11d   :  { %1636 = vmatprep.subr.bf16.mxu0 %v1743_v2 }
 0x1d2   :  { %v325_v12 = vpop.f32.mrb[8].mxu0 }
 0x1d3   :  { %v2014_v13 = vadd.f32 %v325_v12, %v126_v11  ;;  %v1229_v14 = vpop.f32.mrb[9].mxu0 }
 0x1d5   :  { %v330_v16 = vmax.f32 %v2014_v13, 0.0 }
 0x1d7   :  { %1263 = vmatmul.mubr.f32.vlgmr.msra.gmra.mrb[2].mxu1 %v330_v16 }
 0x1d8   :  { %1614 = vmatpush3.bf16.msra.mxu1 %v1802_v9  ;;  %1332 = vmatprep.mubr.msk.f32.mxu1 %vm1744_vm0, %v1745_v4 }
 0x1d9   :  { %1615 = vmatprep.subr.bf16.mxu1 %v1743_v2 }
 0x1dc   :  { %1617 = vmatpush3.bf16.msra.mxu1 %v1817_v15 }
 0x1dd   :  { %1618 = vmatprep.subr.bf16.mxu1 %v1743_v2 }
 0x1e0   :  { %1620 = vmatpush3.bf16.msra.mxu1 %v1833_v21 }
 0x1e1   :  { %1621 = vmatprep.subr.bf16.mxu1 %v1743_v2 }
 0x1e4   :  { %1623 = vmatpush3.bf16.msra.mxu1 %v1852_v28 }
 0x1e5   :  { %1624 = vmatprep.subr.bf16.mxu1 %v1743_v2 }
 0x1e8   :  { %1626 = vmatpush3.bf16.msra.mxu1 %v1868_v34 }
 0x1e9   :  { %1627 = vmatprep.subr.bf16.mxu1 %v1743_v2 }
 0x1ec   :  { %1629 = vmatpush3.bf16.msra.mxu1 %v1884_v40 }
 0x1ed   :  { %1630 = vmatprep.subr.bf16.mxu1 %v1743_v2 }
 0x1f0   :  { %1632 = vmatpush3.bf16.msra.mxu1 %v1900_v46 }
 0x1f1   :  { %1633 = vmatprep.subr.bf16.mxu1 %v1743_v2 }
 0x1f4   :  { %1635 = vmatpush3.bf16.msra.mxu1 %v1910_v50 }
 0x1f5   :  { %1660 = vmatprep.subr.bf16.mxu1 %v1743_v2 }
 0x2aa   :  { %v400_v18 = vpop.f32.mrb[2].mxu1 }
 0x2ab   :  { %v2038_v19 = vadd.f32 %v400_v18, %v131_v17  ;;  %v1264_v20 = vpop.f32.mrb[3].mxu1  ;;  %v156_v17 = vadd.f32 %v2009_v8, %v1977_v58 }
 0x2ad   :  { %v405_v22 = vmax.f32 %v2038_v19, 0.0 }
 0x2af   :  { %1298 = vmatmul.mubr.f32.vlgmr.msra.gmra.mrb[10].mxu0 %v405_v22 }
 0x2b0   :  { %1638 = vmatpush3.bf16.msra.mxu0 %v1802_v9  ;;  %1367 = vmatprep.mubr.msk.f32.mxu0 %vm1744_vm0, %v1745_v4 }
 0x2b1   :  { %1639 = vmatprep.subr.bf16.mxu0 %v1743_v2 }
 0x2b4   :  { %1641 = vmatpush3.bf16.msra.mxu0 %v1817_v15 }
 0x2b5   :  { %1642 = vmatprep.subr.bf16.mxu0 %v1743_v2 }
 0x2b8   :  { %1644 = vmatpush3.bf16.msra.mxu0 %v1833_v21 }
 0x2b9   :  { %1645 = vmatprep.subr.bf16.mxu0 %v1743_v2 }
 0x2bc   :  { %1647 = vmatpush3.bf16.msra.mxu0 %v1852_v28 }
 0x2bd   :  { %1648 = vmatprep.subr.bf16.mxu0 %v1743_v2 }
 0x2c0   :  { %1650 = vmatpush3.bf16.msra.mxu0 %v1868_v34 }
 0x2c1   :  { %1651 = vmatprep.subr.bf16.mxu0 %v1743_v2 }
 0x2c4   :  { %1653 = vmatpush3.bf16.msra.mxu0 %v1884_v40 }
 0x2c5   :  { %1654 = vmatprep.subr.bf16.mxu0 %v1743_v2 }
 0x2c8   :  { %1656 = vmatpush3.bf16.msra.mxu0 %v1900_v46 }
 0x2c9   :  { %1657 = vmatprep.subr.bf16.mxu0 %v1743_v2 }
 0x2cc   :  { %1659 = vmatpush3.bf16.msra.mxu0 %v1910_v50 }
 0x2cd   :  { %1684 = vmatprep.subr.bf16.mxu0 %v1743_v2 }
 0x382   :  { %v475_v24 = vpop.f32.mrb[10].mxu0 }
 0x383   :  { %v2063_v25 = vadd.f32 %v475_v24, %v136_v23  ;;  %v1299_v26 = vpop.f32.mrb[11].mxu0 }
 0x385   :  { %v480_v27 = vmax.f32 %v2063_v25, 0.0 }
 0x387   :  { %1333 = vmatmul.mubr.f32.vlgmr.msra.gmra.mrb[4].mxu1 %v480_v27 }
 0x388   :  { %1662 = vmatpush3.bf16.msra.mxu1 %v1802_v9  ;;  %1402 = vmatprep.mubr.msk.f32.mxu1 %vm1744_vm0, %v1745_v4 }
 0x389   :  { %1663 = vmatprep.subr.bf16.mxu1 %v1743_v2 }
 0x38c   :  { %1665 = vmatpush3.bf16.msra.mxu1 %v1817_v15 }
 0x38d   :  { %1666 = vmatprep.subr.bf16.mxu1 %v1743_v2 }
 0x390   :  { %1668 = vmatpush3.bf16.msra.mxu1 %v1833_v21 }
 0x391   :  { %1669 = vmatprep.subr.bf16.mxu1 %v1743_v2 }
 0x394   :  { %1671 = vmatpush3.bf16.msra.mxu1 %v1852_v28 }
 0x395   :  { %1672 = vmatprep.subr.bf16.mxu1 %v1743_v2 }
 0x398   :  { %1674 = vmatpush3.bf16.msra.mxu1 %v1868_v34 }
 0x399   :  { %1675 = vmatprep.subr.bf16.mxu1 %v1743_v2 }
 0x39c   :  { %1677 = vmatpush3.bf16.msra.mxu1 %v1884_v40 }
 0x39d   :  { %1678 = vmatprep.subr.bf16.mxu1 %v1743_v2 }
 0x3a0   :  { %1680 = vmatpush3.bf16.msra.mxu1 %v1900_v46 }
 0x3a1   :  { %1681 = vmatprep.subr.bf16.mxu1 %v1743_v2 }
 0x3a4   :  { %1683 = vmatpush3.bf16.msra.mxu1 %v1910_v50 }
 0x45a   :  { %v550_v30 = vpop.f32.mrb[4].mxu1 }
 0x45b   :  { %v2087_v31 = vadd.f32 %v550_v30, %v141_v29  ;;  %v1334_v32 = vpop.f32.mrb[5].mxu1 }
 0x45d   :  { %v555_v33 = vmax.f32 %v2087_v31, 0.0 }
 0x45f   :  { %1368 = vmatmul.mubr.f32.vlgmr.msra.gmra.mrb[12].mxu0 %v555_v33 }
 0x460   :  { %1686 = vmatpush3.bf16.msra.mxu0 %v1802_v9  ;;  %1437 = vmatprep.mubr.msk.f32.mxu0 %vm1744_vm0, %v1745_v4  ;;  %v790_v4 = vld [vmem:[%s2204_s3] sm:$0xff]  ;;  %v791_v9 = vld [vmem:[%s2204_s3 + $0x8] sm:$0xff] }
 0x461   :  { %1687 = vmatprep.subr.bf16.mxu0 %v1743_v2 }
 0x464   :  { %1689 = vmatpush3.bf16.msra.mxu0 %v1817_v15  ;;  %v1708_v15 = vpack.c.bf16 %v791_v9, %v790_v4 }
 0x465   :  { %1690 = vmatprep.subr.bf16.mxu0 %v1743_v2 }
 0x466   :  { %1709 = vmatprep.subr.bf16.mxu1 %v1708_v15 }
 0x468   :  { %1692 = vmatpush3.bf16.msra.mxu0 %v1833_v21  ;;  %v146_v21 = vadd.f32 %v1987_v6, %v1977_v58 }
 0x469   :  { %1693 = vmatprep.subr.bf16.mxu0 %v1743_v2 }
 0x46c   :  { %1695 = vmatpush3.bf16.msra.mxu0 %v1852_v28 }
 0x46d   :  { %1696 = vmatprep.subr.bf16.mxu0 %v1743_v2 }
 0x470   :  { %1698 = vmatpush3.bf16.msra.mxu0 %v1868_v34  ;;  %v793_v34 = vld [vmem:[%s2204_s3 + $0x18] sm:$0xff] }
 0x471   :  { %1699 = vmatprep.subr.bf16.mxu0 %v1743_v2 }
 0x474   :  { %1701 = vmatpush3.bf16.msra.mxu0 %v1884_v40  ;;  %v795_v40 = vld [vmem:[%s2204_s3 + $0x28] sm:$0xff] }
 0x475   :  { %1702 = vmatprep.subr.bf16.mxu0 %v1743_v2  ;;  %v1716_v41 = vpack.c.bf16 %v795_v40, %v794_v39 }
 0x478   :  { %1704 = vmatpush3.bf16.msra.mxu0 %v1900_v46  ;;  %v799_v46 = vld [vmem:[%s2204_s3 + $0x48] sm:$0xff] }
 0x479   :  { %1705 = vmatprep.subr.bf16.mxu0 %v1743_v2  ;;  %v792_v2 = vld [vmem:[%s2204_s3 + $0x10] sm:$0xff]  ;;  %v1724_v47 = vpack.c.bf16 %v799_v46, %v798_v45 }
 0x47a   :  { %v1712_v38 = vpack.c.bf16 %v793_v34, %v792_v2 }
 0x47c   :  { %1707 = vmatpush3.bf16.msra.mxu0 %v1910_v50  ;;  %v1728_v50 = vpack.c.bf16 %v801_v49, %v800_v48 }
 0x532   :  { %v625_v28 = vpop.f32.mrb[12].mxu0 }
 0x533   :  { %v629_v35 = vadd.f32 %v625_v28, %v146_v21  ;;  %v1369_v36 = vpop.f32.mrb[13].mxu0 }
 0x535   :  { %v630_v37 = vmax.f32 %v629_v35, 0.0 }
 0x537   :  { %1403 = vmatmul.mubr.f32.vlgmr.msra.gmra.mrb[6].mxu1 %v630_v37 }
 0x538   :  { %1711 = vmatpush3.bf16.msra.mxu1 %v1708_v15  ;;  %1472 = vmatprep.mubr.f32.mxu1 %v255_v5 }
 0x539   :  { %1713 = vmatprep.subr.bf16.mxu1 %v1712_v38 }
 0x53c   :  { %1715 = vmatpush3.bf16.msra.mxu1 %v1712_v38 }
 0x53d   :  { %1717 = vmatprep.subr.bf16.mxu1 %v1716_v41 }
 0x540   :  { %1719 = vmatpush3.bf16.msra.mxu1 %v1716_v41 }
 0x541   :  { %1721 = vmatprep.subr.bf16.mxu1 %v1720_v44 }
 0x544   :  { %1723 = vmatpush3.bf16.msra.mxu1 %v1720_v44 }
 0x545   :  { %1725 = vmatprep.subr.bf16.mxu1 %v1724_v47 }
 0x548   :  { %1727 = vmatpush3.bf16.msra.mxu1 %v1724_v47 }
 0x549   :  { %1729 = vmatprep.subr.bf16.mxu1 %v1728_v50 }
 0x54c   :  { %1731 = vmatpush3.bf16.msra.mxu1 %v1728_v50 }
 0x54d   :  { %1733 = vmatprep.subr.bf16.mxu1 %v1732_v53 }
 0x550   :  { %1735 = vmatpush3.bf16.msra.mxu1 %v1732_v53 }
 0x551   :  { %1737 = vmatprep.subr.bf16.mxu1 %v1736_v56 }
 0x554   :  { %1739 = vmatpush3.bf16.msra.mxu1 %v1736_v56 }
 0x557   :  { %1473 = vmatmul.mubr.f32.vlgmr.msra.gmra.mrb[8].mxu1 %v330_v16 }
 0x558   :  { %1475 = vmatprep.mubr.f32.mxu1 %v405_v22 }
 0x55b   :  { %1476 = vmatmul.mubr.f32.gmra.mrb[10].mxu1 %v480_v27 }
 0x55c   :  { %1478 = vmatprep.mubr.f32.mxu1 %v555_v33 }
 0x55f   :  { %1479 = vmatmul.mubr.f32.gmra.mrb[12].mxu1 %v630_v37 }
 0x60a   :  { %v700_v59 = vpop.f32.mrb[6].mxu1 }
 0x60b   :  { %v704_v60 = vadd.f32 %v700_v59, %v151_v57  ;;  %v1404_v61 = vpop.f32.mrb[7].mxu1 }
 0x60d   :  { %v705_v62 = vmax.f32 %v704_v60, 0.0 }
 0x60f   :  { %1438 = vmatmul.mubr.f32.vlgmr.msra.gmra.mrb[14].mxu0 %v705_v62  ;;  %1481 = vmatprep.mubr.f32.mxu1 %v705_v62 }
 0x62a   :  { %v1474_v0 = vpop.f32.mrb[8].mxu1 }
 0x62b   :  { %v885_v1 = vadd.f32 %v1474_v0, %v931_v63  ;;  %v879_v3 = vpop.f32.mrb[9].mxu1 }
 0x62c   :  { %v880_v5 = vadd.f32 %v931_v63, %v879_v3 }
 0x62d   :  { %919 = vst [vmem:[%s2206_s6 + $0x8] sm:$0xff] %v885_v1 }
 0x62e   :  { %918 = vst [vmem:[%s2206_s6] sm:$0xff] %v880_v5  ;;  %v1477_v6 = vpop.f32.mrb[10].mxu1 }
 0x62f   :  { %v895_v7 = vadd.f32 %v1477_v6, %v931_v63  ;;  %v889_v10 = vpop.f32.mrb[11].mxu1 }
 0x630   :  { %v890_v11 = vadd.f32 %v931_v63, %v889_v10 }
 0x631   :  { %921 = vst [vmem:[%s2206_s6 + $0x18] sm:$0xff] %v895_v7 }
 0x632   :  { %920 = vst [vmem:[%s2206_s6 + $0x10] sm:$0xff] %v890_v11  ;;  %v1480_v12 = vpop.f32.mrb[12].mxu1 }
 0x633   :  { %v905_v13 = vadd.f32 %v1480_v12, %v931_v63  ;;  %v899_v14 = vpop.f32.mrb[13].mxu1 }
 0x634   :  { %v900_v16 = vadd.f32 %v931_v63, %v899_v14 }
 0x635   :  { %923 = vst [vmem:[%s2206_s6 + $0x28] sm:$0xff] %v905_v13 }
 0x636   :  { %922 = vst [vmem:[%s2206_s6 + $0x20] sm:$0xff] %v900_v16 }
 0x6e2   :  { %v775_v18 = vpop.f32.mrb[14].mxu0 }
 0x6e3   :  { %v779_v19 = vadd.f32 %v775_v18, %v156_v17  ;;  %v1439_v20 = vpop.f32.mrb[15].mxu0 }
 0x6e5   :  { %v780_v22 = vmax.f32 %v779_v19, 0.0 }
 0x6e7   :  { %1482 = vmatmul.mubr.f32.gmra.mrb[14].mxu1 %v780_v22 }
 0x7ba   :  { %v1483_v23 = vpop.f32.mrb[14].mxu1 }
 0x7bb   :  { %v915_v24 = vadd.f32 %v1483_v23, %v931_v63  ;;  %v909_v25 = vpop.f32.mrb[15].mxu1 }
 0x7bc   :  { %v910_v26 = vadd.f32 %v931_v63, %v909_v25 }
 0x7bd   :  { %925 = vst [vmem:[%s2206_s6 + $0x38] sm:$0xff] %v915_v24 }
 0x7be   :  { %924 = vst [vmem:[%s2206_s6 + $0x30] sm:$0xff] %v910_v26 }

</bundles_post_ra>
